<compile_context>
chip_gen: v7x
topology: tpu7x:2x2x1
jax: 0.10.0
libtpu: 0.0.40
codegen_flags: <defaults>
</compile_context>

<pallas_src>
import jax
import jax.numpy as jnp
import numpy as np
from jax import lax
from jax.experimental import pallas as pl
from jax.experimental.pallas import tpu as pltpu

IN_FEATURES = 1 * 28 * 28   # 784
HIDDEN = 28
OUT_FEATURES = 10


def _round_up(n, m):
    return (n + m - 1) // m * m


def _select_tiling():
    """Per-generation (batch-tile cap, scoped-VMEM limit).

    v5e/v6e: 128 MiB physical VMEM -> 4096-row tiles (~29 MiB x double-buffer
             for the lane-padded 784->896 input) under a 96 MiB scoped limit.
    v7x    : 64 MiB / TensorCore   -> 2048-row tiles under 48 MiB.
    Unknown / interpret            -> conservative v7x numbers (safe everywhere).
    """
    vmem_cap = 64 * 1024 * 1024
    try:
        vmem_cap = int(pltpu.get_tpu_info().vmem_capacity_bytes)
    except Exception:
        pass
    if vmem_cap >= 128 * 1024 * 1024:
        return 4096, 96 * 1024 * 1024
    return 2048, 48 * 1024 * 1024


_TB_MAX, _VMEM_LIMIT = _select_tiling()


def _mlp_kernel(x_ref, w1_ref, b1_ref, w2_ref, b2_ref, o_ref):
    # x_ref:  [TB, 784] f32    w1_ref: [784, 28] bf16   b1_ref: [1, 28]  f32
    # w2_ref: [28, 10]  f32    b2_ref: [1, 10]   f32    o_ref:  [TB, 10] f32
    x = x_ref[...]

    # fn1: Linear(784 -> 28). bf16 operands -> single-pass MXU, f32 accumulation.
    h = jnp.dot(x.astype(jnp.bfloat16), w1_ref[...],
                preferred_element_type=jnp.float32) + b1_ref[...]
    h = jnp.maximum(h, 0.0)

    # fn2: Linear(28 -> 10). Tiny K=28; f32 accumulation.
    logits = jnp.dot(h, w2_ref[...], preferred_element_type=jnp.float32) + b2_ref[...]

    # log_softmax along last axis (numerically stable, purely row-wise).
    # NOTE: garbage rows in a ragged tail tile may produce NaN here; those rows'
    # output stores are masked (OOB writes dropped), so do NOT "fix" this by
    # re-introducing a wrapper-side pad — that costs an extra HBM pass over x.
    m = jnp.max(logits, axis=-1, keepdims=True)
    shifted = logits - m
    lse = jnp.log(jnp.sum(jnp.exp(shifted), axis=-1, keepdims=True))
    o_ref[...] = (shifted - lse).astype(o_ref.dtype)


def _my_model_forward(x_nchw, w1, b1, w2, b2):
    """x_nchw: [B, 1, 28, 28] float32 -> log-probs [B, 10]."""
    B = x_nchw.shape[0]
    x_flat = x_nchw.reshape(B, IN_FEATURES)             # view-style reshape

    # Batch tile: multiple of 8 (sublane); aim for >= 2 tiles so both v7x
    # TensorCores get work; capped per generation. Ragged tail is masked.
    tb = min(_TB_MAX, max(8, _round_up(pl.cdiv(B, 2), 8)))
    num_tiles = pl.cdiv(B, tb)

    # nn.Linear stores W as [out, in]; transpose once (constant-folded under jit)
    # so the kernel does x @ W, matching y = x @ W^T + b. W1 is kept in bf16.
    w1_t = w1.T.astype(jnp.bfloat16)                     # [784, 28] bf16
    w2_t = w2.T                                          # [28, 10]  f32
    b1_2d = b1.reshape(1, HIDDEN)
    b2_2d = b2.reshape(1, OUT_FEATURES)

    grid_spec = pltpu.PrefetchScalarGridSpec(
        num_scalar_prefetch=0,
        grid=(num_tiles,),
        in_specs=[
            pl.BlockSpec((tb, IN_FEATURES), lambda i: (i, 0)),          # x tiles
            pl.BlockSpec((IN_FEATURES, HIDDEN), lambda i: (0, 0)),      # W1 resident
            pl.BlockSpec((1, HIDDEN), lambda i: (0, 0)),                # b1 resident
            pl.BlockSpec((HIDDEN, OUT_FEATURES), lambda i: (0, 0)),     # W2 resident
            pl.BlockSpec((1, OUT_FEATURES), lambda i: (0, 0)),          # b2 resident
        ],
        out_specs=pl.BlockSpec((tb, OUT_FEATURES), lambda i: (i, 0)),
    )

    flops = 2 * B * (IN_FEATURES * HIDDEN + HIDDEN * OUT_FEATURES)
    bytes_accessed = (
        B * (IN_FEATURES + OUT_FEATURES) * 4
        + IN_FEATURES * HIDDEN * 2                       # W1 bf16
        + (HIDDEN + HIDDEN * OUT_FEATURES + OUT_FEATURES) * 4
    )
    cost = pl.CostEstimate(
        flops=flops,
        transcendentals=B * (OUT_FEATURES + 1),          # exp per logit + log per row
        bytes_accessed=bytes_accessed,
    )

    return pl.pallas_call(
        _mlp_kernel,
        out_shape=jax.ShapeDtypeStruct((B, OUT_FEATURES), jnp.float32),
        grid_spec=grid_spec,
        compiler_params=pltpu.CompilerParams(
            dimension_semantics=("parallel",),           # shard tiles over v7x's 2 TCs
            vmem_limit_bytes=_VMEM_LIMIT,
        ),
        cost_estimate=cost,
    )(x_flat, w1_t, b1_2d, w2_t, b2_2d)


my_model_forward = jax.jit(_my_model_forward)


def _init_linear(key, out_features, in_features):
    # Deterministic init mimicking PyTorch nn.Linear default (U[-1/sqrt(fan_in), +])
    kw, kb = jax.random.split(key)
    bound = 1.0 / np.sqrt(in_features)
    w = jax.random.uniform(kw, (out_features, in_features), jnp.float32, -bound, bound)
    b = jax.random.uniform(kb, (out_features,), jnp.float32, -bound, bound)
    return w, b


def _reference_forward(x_nchw, w1, b1, w2, b2):
    # Full-f32 reference (matches PyTorch f32 semantics).
    x = x_nchw.reshape(x_nchw.shape[0], -1)
    h = jnp.maximum(jnp.dot(x, w1.T, precision=lax.Precision.HIGHEST) + b1, 0.0)
    logits = jnp.dot(h, w2.T, precision=lax.Precision.HIGHEST) + b2
    return jax.nn.log_softmax(logits, axis=-1)


if __name__ == "__main__":
    key = jax.random.PRNGKey(0)
    k_x, k_x2, k_fn1, k_fn2 = jax.random.split(key, 4)

    w1, b1 = _init_linear(k_fn1, HIDDEN, IN_FEATURES)    # fn1: Linear(784, 28)
    w2, b2 = _init_linear(k_fn2, OUT_FEATURES, HIDDEN)   # fn2: Linear(28, 10)

    # Small-shape check (batch=2 -> one 8-row tile, rows 2..7 masked on store).
    x_small = jax.random.normal(k_x, (2, 1, 28, 28), jnp.float32)
    out_small = jax.block_until_ready(my_model_forward(x_small, w1, b1, w2, b2))
    ref_small = _reference_forward(x_small, w1, b1, w2, b2)
    np.testing.assert_allclose(np.asarray(out_small), np.asarray(ref_small),
                               rtol=2e-2, atol=2e-2)

    # Ragged multi-tile check (batch=300 -> two 152-row tiles, masked tail, no pad).
    x_big = jax.random.normal(k_x2, (300, 1, 28, 28), jnp.float32)
    out_big = jax.block_until_ready(my_model_forward(x_big, w1, b1, w2, b2))
    ref_big = _reference_forward(x_big, w1, b1, w2, b2)
    np.testing.assert_allclose(np.asarray(out_big), np.asarray(ref_big),
                               rtol=2e-2, atol=2e-2)

    print("KERNEL_OK")
</pallas_src>

<mosaic_0001>
module attributes {stable_mosaic.version = 11 : i64} {
  func.func @_mlp_kernel(%arg0: i32, %arg1: memref<8x784xf32, #tpu.memory_space<vmem>>, %arg2: memref<784x28xbf16, #tpu.memory_space<vmem>>, %arg3: memref<1x28xf32, #tpu.memory_space<vmem>>, %arg4: memref<28x10xf32, #tpu.memory_space<vmem>>, %arg5: memref<1x10xf32, #tpu.memory_space<vmem>>, %arg6: memref<8x10xf32, #tpu.memory_space<vmem>>) attributes {dimension_semantics = [#tpu.dimension_semantics<parallel>], iteration_bounds = array<i64: 1>, scalar_prefetch = 0 : i64, scratch_operands = 0 : i64, tpu.core_type = #tpu.core_type<tc>, window_params = [{transform_indices = @transform_0, window_bounds = array<i64: 8, 784>}, {pipeline_mode = #tpu.pipeline_mode<synchronous>, transform_indices = @transform_1, window_bounds = array<i64: 784, 28>}, {pipeline_mode = #tpu.pipeline_mode<synchronous>, transform_indices = @transform_2, window_bounds = array<i64: 1, 28>}, {pipeline_mode = #tpu.pipeline_mode<synchronous>, transform_indices = @transform_3, window_bounds = array<i64: 28, 10>}, {pipeline_mode = #tpu.pipeline_mode<synchronous>, transform_indices = @transform_4, window_bounds = array<i64: 1, 10>}, {transform_indices = @transform_5, window_bounds = array<i64: 8, 10>}]} {
    %c0 = arith.constant 0 : index
    %c0_0 = arith.constant 0 : index
    %0 = vector.load %arg1[%c0, %c0_0] : memref<8x784xf32, #tpu.memory_space<vmem>>, vector<8x784xf32>
    %1 = arith.truncf %0 : vector<8x784xf32> to vector<8x784xbf16>
    %c0_1 = arith.constant 0 : index
    %c0_2 = arith.constant 0 : index
    %2 = vector.load %arg2[%c0_1, %c0_2] : memref<784x28xbf16, #tpu.memory_space<vmem>>, vector<784x28xbf16>
    %cst = arith.constant dense<0.000000e+00> : vector<8x28xf32>
    %3 = tpu.matmul %1, %2, %cst {dimension_numbers = #tpu.dot_dimension_numbers<[1], [0], [0], [1], [0, 0, 1, 1], [], []>} : vector<8x784xbf16>, vector<784x28xbf16>, vector<8x28xf32> -> vector<8x28xf32>
    %c0_3 = arith.constant 0 : index
    %c0_4 = arith.constant 0 : index
    %4 = vector.load %arg3[%c0_3, %c0_4] : memref<1x28xf32, #tpu.memory_space<vmem>>, vector<1x28xf32>
    %5 = vector.broadcast %4 : vector<1x28xf32> to vector<8x28xf32>
    %6 = arith.addf %3, %5 : vector<8x28xf32>
    %cst_5 = arith.constant 0.000000e+00 : f32
    %7 = vector.broadcast %cst_5 : f32 to vector<8x28xf32>
    %8 = arith.maximumf %6, %7 : vector<8x28xf32>
    %c0_6 = arith.constant 0 : index
    %c0_7 = arith.constant 0 : index
    %9 = vector.load %arg4[%c0_6, %c0_7] : memref<28x10xf32, #tpu.memory_space<vmem>>, vector<28x10xf32>
    %cst_8 = arith.constant dense<0.000000e+00> : vector<8x10xf32>
    %10 = tpu.matmul %8, %9, %cst_8 {dimension_numbers = #tpu.dot_dimension_numbers<[1], [0], [0], [1], [0, 0, 1, 1], [], []>} : vector<8x28xf32>, vector<28x10xf32>, vector<8x10xf32> -> vector<8x10xf32>
    %c0_9 = arith.constant 0 : index
    %c0_10 = arith.constant 0 : index
    %11 = vector.load %arg5[%c0_9, %c0_10] : memref<1x10xf32, #tpu.memory_space<vmem>>, vector<1x10xf32>
    %12 = vector.broadcast %11 : vector<1x10xf32> to vector<8x10xf32>
    %13 = arith.addf %10, %12 : vector<8x10xf32>
    %cst_11 = arith.constant dense<0xFF800000> : vector<8xf32>
    %14 = vector.multi_reduction <maximumf>, %13, %cst_11 [1] : vector<8x10xf32> to vector<8xf32>
    %15 = vector.shape_cast %14 : vector<8xf32> to vector<8x1xf32>
    %16 = vector.broadcast %15 : vector<8x1xf32> to vector<8x10xf32>
    %17 = arith.subf %13, %16 : vector<8x10xf32>
    %18 = math.exp %17 : vector<8x10xf32>
    %cst_12 = arith.constant dense<0.000000e+00> : vector<8xf32>
    %19 = vector.multi_reduction <add>, %18, %cst_12 [1] : vector<8x10xf32> to vector<8xf32>
    %20 = vector.shape_cast %19 : vector<8xf32> to vector<8x1xf32>
    %21 = math.log %20 : vector<8x1xf32>
    %22 = vector.broadcast %21 : vector<8x1xf32> to vector<8x10xf32>
    %23 = arith.subf %17, %22 : vector<8x10xf32>
    %c0_13 = arith.constant 0 : index
    %c0_14 = arith.constant 0 : index
    %24 = vector.load %arg6[%c0_13, %c0_14] : memref<8x10xf32, #tpu.memory_space<vmem>>, vector<8x10xf32>
    tpu.vector_store %arg6[%c0_13, %c0_14], %23 {strides = array<i32>} : memref<8x10xf32, #tpu.memory_space<vmem>>, vector<8x10xf32>,
    return
  }
  func.func @transform_0(%arg0: i32) -> (i32, i32) {
    %c0_i32 = arith.constant 0 : i32
    %c0_i32_0 = arith.constant 0 : i32
    return %arg0, %c0_i32 : i32, i32
  }
  func.func @transform_1(%arg0: i32) -> (i32, i32) {
    %c0_i32 = arith.constant 0 : i32
    %c0_i32_0 = arith.constant 0 : i32
    %c0_i32_1 = arith.constant 0 : i32
    return %c0_i32, %c0_i32_0 : i32, i32
  }
  func.func @transform_2(%arg0: i32) -> (i32, i32) {
    %c0_i32 = arith.constant 0 : i32
    %c0_i32_0 = arith.constant 0 : i32
    %c0_i32_1 = arith.constant 0 : i32
    return %c0_i32, %c0_i32_0 : i32, i32
  }
  func.func @transform_3(%arg0: i32) -> (i32, i32) {
    %c0_i32 = arith.constant 0 : i32
    %c0_i32_0 = arith.constant 0 : i32
    %c0_i32_1 = arith.constant 0 : i32
    return %c0_i32, %c0_i32_0 : i32, i32
  }
  func.func @transform_4(%arg0: i32) -> (i32, i32) {
    %c0_i32 = arith.constant 0 : i32
    %c0_i32_0 = arith.constant 0 : i32
    %c0_i32_1 = arith.constant 0 : i32
    return %c0_i32, %c0_i32_0 : i32, i32
  }
  func.func @transform_5(%arg0: i32) -> (i32, i32) {
    %c0_i32 = arith.constant 0 : i32
    %c0_i32_0 = arith.constant 0 : i32
    return %arg0, %c0_i32 : i32, i32
  }
}

</mosaic_0001>

<bundles_post_ra>
// kernel: _my_model_forward.1
= control target key start
LH: loop header
LB: loop body
LE: loop exit
PB: predicated region body
PF: predicated region fallthrough
CT: control target
= control target key end

     0   :  { %10 = vsyncpa [#allocation3], 0  ;;  %v45_v28 = vlaneseq  ;;  %v1054_v33 = vmov 1983009808   ;;  %v1055_v43 = vmov 0.0   ;;  %vm1056_vm0 = vmmov 0   ;;  %s1298_s0 = inlined_call_operand.vmem [shape: f32[2,784], index: 0, kind: input, shape index: {}]   ;;  %s1299_s1 = inlined_call_operand.vmem [shape: bf16[784,28], index: 1, kind: input, shape index: {}]   ;;  %s1300_s2 = inlined_call_operand.vmem [shape: f32[1,28], index: 2, kind: input, shape index: {}]   ;;  %s1301_s3 = inlined_call_operand.vmem [shape: f32[28,10], index: 3, kind: input, shape index: {}]   ;;  %s1302_s4 = inlined_call_operand.vmem [shape: f32[1,10], index: 4, kind: input, shape index: {}]   ;;  %s1303_s5 = inlined_call_operand.hbm [shape: f32[2,10], index: 5, kind: output, shape index: {}]  }
   0x1   :  { %v965_v0 = vld [vmem:[%s1299_s1 + $0x40] sm:$0xff]   ;;  %v969_v4 = vld [vmem:[%s1299_s1 + $0x48] sm:$0xff]   ;;  %v973_v8 = vld [vmem:[%s1299_s1 + $0x50] sm:$0xff]   ;;  %v43_v34 = vunpack.c.l.s4 %v1054_v33  ;;  %vm522_vm1 = vcmask 130048   ;;  %vm702_vm2 = vcmask 1043456   ;;  %vm1058_vm3 = vmmov 1  }
   0x2   :  { %v966_v1 = vld [vmem:[%s1299_s1] sm:$0xff]   ;;  %860 = vmatprep.subr.bf16.mxu0 %v965_v0  ;;  %v970_v5 = vld [vmem:[%s1299_s1 + $0x8] sm:$0xff]   ;;  %v974_v9 = vld [vmem:[%s1299_s1 + $0x10] sm:$0xff]   ;;  %v46_v35 = vshrl.u32 %v45_v28, 7  ;;  %vm698_vm5 = vcmask 228352   ;;  %vm776_vm6 = vcmask 80896  }
   0x3   :  { %v967_v2 = vld [vmem:[%s1299_s1 + $0xc0] sm:$0xff]   ;;  %861 = vmatpush3.bf16.msra.mxu0 %v966_v1  ;;  %v971_v6 = vld [vmem:[%s1299_s1 + $0xc8] sm:$0xff]   ;;  %v975_v10 = vld [vmem:[%s1299_s1 + $0xd0] sm:$0xff]   ;;  %v44_v37 = vunpack.c.0.s8 %v43_v34 }
   0x4   :  { %v968_v3 = vld [vmem:[%s1299_s1 + $0x80] sm:$0xff]   ;;  %882 = vmatprep.subr.bf16.mxu1 %v967_v2  ;;  %862 = vmatprep.subr.bf16.mxu0 %v969_v4  ;;  %v972_v7 = vld [vmem:[%s1299_s1 + $0x88] sm:$0xff]   ;;  %v976_v11 = vld [vmem:[%s1299_s1 + $0x90] sm:$0xff]  }
   0x5   :  { %883 = vmatpush3.bf16.msra.mxu1 %v968_v3  ;;  %v977_v12 = vld [vmem:[%s1299_s1 + $0x58] sm:$0xff]   ;;  %v981_v16 = vld [vmem:[%s1299_s1 + $0x60] sm:$0xff]   ;;  %v985_v20 = vld [vmem:[%s1299_s1 + $0x68] sm:$0xff]   ;;  %v47_v42 = vsub.s32 %v44_v37, %v46_v35 }
   0x6   :  { %884 = vmatprep.subr.bf16.mxu1 %v971_v6  ;;  %v978_v13 = vld [vmem:[%s1299_s1 + $0x18] sm:$0xff]   ;;  %v982_v17 = vld [vmem:[%s1299_s1 + $0x20] sm:$0xff]   ;;  %v986_v21 = vld [vmem:[%s1299_s1 + $0x28] sm:$0xff]  }
   0x7   :  { %863 = vmatpush3.bf16.msra.mxu0 %v970_v5  ;;  %v979_v14 = vld [vmem:[%s1299_s1 + $0xd8] sm:$0xff]   ;;  %v983_v18 = vld [vmem:[%s1299_s1 + $0xe0] sm:$0xff]   ;;  %v987_v22 = vld [vmem:[%s1299_s1 + $0xe8] sm:$0xff]  }
   0x8   :  { %864 = vmatprep.subr.bf16.mxu0 %v973_v8  ;;  %v980_v15 = vld [vmem:[%s1299_s1 + $0x98] sm:$0xff]   ;;  %v984_v19 = vld [vmem:[%s1299_s1 + $0xa0] sm:$0xff]   ;;  %v988_v23 = vld [vmem:[%s1299_s1 + $0xa8] sm:$0xff]  }
   0x9   :  { %885 = vmatpush3.bf16.msra.mxu1 %v972_v7  ;;  %v989_v24 = vld [vmem:[%s1299_s1 + $0x70] sm:$0xff]   ;;  %v993_v29 = vld [vmem:[%s1299_s1 + $0x78] sm:$0xff]   ;;  %v1001_v39 = vld [vmem:[%s1299_s1 + $0x140] sm:$0xff]  }
   0xa   :  { %886 = vmatprep.subr.bf16.mxu1 %v975_v10  ;;  %v990_v25 = vld [vmem:[%s1299_s1 + $0x30] sm:$0xff]   ;;  %v994_v30 = vld [vmem:[%s1299_s1 + $0x38] sm:$0xff]   ;;  %v1004_v55 = vld [vmem:[%s1299_s1 + $0x100] sm:$0xff]  }
   0xb   :  { %865 = vmatpush3.bf16.msra.mxu0 %v974_v9  ;;  %v991_v26 = vld [vmem:[%s1299_s1 + $0xf0] sm:$0xff]   ;;  %v995_v31 = vld [vmem:[%s1299_s1 + $0xf8] sm:$0xff]   ;;  %v1005_v57 = vld [vmem:[%s1299_s1 + $0x148] sm:$0xff]  }
   0xc   :  { %866 = vmatprep.subr.bf16.mxu0 %v977_v12  ;;  %v992_v27 = vld [vmem:[%s1299_s1 + $0xb0] sm:$0xff]   ;;  %v998_v36 = vld [vmem:[%s1298_s0 + $0x1c] ss:$14 sps:$4 sm:$0xff]   ;;  %v1019_v62 = vld [vmem:[%s1299_s1 + $0x180] sm:$0xff]  }
   0xd   :  { %887 = vmatpush3.bf16.msra.mxu1 %v976_v11  ;;  %v996_v32 = vld [vmem:[%s1298_s0] ss:$14 sps:$4 sm:$0xff]   ;;  %v1000_v38 = vld [vmem:[%s1299_s1 + $0xb8] sm:$0xff]   ;;  %v1002_v40 = vld [vmem:[%s1298_s0 + $0x4] ss:$14 sps:$4 sm:$0xff]   ;;  %v62_v45 = vrot.slane %v998_v36, %v47_v42 }
   0xe   :  { %888 = vmatprep.subr.bf16.mxu1 %v979_v14  ;;  %v1003_v41 = vld [vmem:[%s1298_s0 + $0x20] ss:$14 sps:$4 sm:$0xff]   ;;  %v48_v44 = vrot.slane %v996_v32, %v47_v42  ;;  %v55_v46 = vrot.slane %v1002_v40, %v47_v42  ;;  %v1009_v61 = vld [vmem:[%s1299_s1 + $0x158] sm:$0xff]   ;;  %v1023_v1 = vld [vmem:[%s1298_s0 + $0x24] ss:$14 sps:$4 sm:$0xff]  }
   0xf   :  { %867 = vmatpush3.bf16.msra.mxu0 %v978_v13  ;;  %v69_v47 = vrot.slane %v1003_v41, %v47_v42  ;;  %v1006_v58 = vld [vmem:[%s1299_s1 + $0x108] sm:$0xff]   ;;  %v1007_v59 = vld [vmem:[%s1299_s1 + $0x150] sm:$0xff]   ;;  %v1010_v63 = vld [vmem:[%s1299_s1 + $0x118] sm:$0xff]   ;;  %v98_v6 = vrot.slane %v1023_v1, %v47_v42 }
  0x10   :  { %868 = vmatprep.subr.bf16.mxu0 %v981_v16  ;;  %v71_v48 = vcombine.high %v48_v44, %v62_v45  ;;  %v70_v49 = vcombine.low %v48_v44, %v62_v45  ;;  %v1008_v60 = vld [vmem:[%s1299_s1 + $0x110] sm:$0xff]   ;;  %v1022_v2 = vld [vmem:[%s1298_s0 + $0xc] ss:$14 sps:$4 sm:$0x33]   ;;  %v1011_v4 = vld [vmem:[%s1299_s1 + $0x160] sm:$0xff]  }
  0x11   :  { %889 = vmatpush3.bf16.msra.mxu1 %v980_v15  ;;  %v73_v50 = vcombine.high %v55_v46, %v69_v47  ;;  %v72_v51 = vcombine.low %v55_v46, %v69_v47  ;;  %v1020_v0 = vld [vmem:[%s1298_s0 + $0x8] ss:$14 sps:$4 sm:$0xff]   ;;  %v91_v7 = vrot.slane %v1022_v2, %v47_v42  ;;  %v1012_v10 = vld [vmem:[%s1299_s1 + $0x120] sm:$0xff]   ;;  %vm955_vm4 = vmpackc.low %vm702_vm2, %vm1058_vm3 }
  0x12   :  { %890 = vmatprep.subr.bf16.mxu1 %v983_v18  ;;  %v117_v52 = vpack.c.bf16 %v71_v48, %v71_v48  ;;  %v116_v53 = vpack.c.bf16 %v70_v49, %v70_v49  ;;  %v1025_v3 = vld [vmem:[%s1298_s0 + $0x28] ss:$14 sps:$4 sm:$0x33]   ;;  %v84_v5 = vrot.slane %v1020_v0, %v47_v42  ;;  %v1017_v18 = vld [vmem:[%s1299_s1 + $0x178] sm:$0xff]  }
  0x13   :  { %869 = vmatpush3.bf16.msra.mxu0 %v982_v17  ;;  %v119_v54 = vpack.c.bf16 %v73_v50, %v73_v50  ;;  %v118_v56 = vpack.c.bf16 %v72_v51, %v72_v51  ;;  %v105_v8 = vrot.slane %v1025_v3, %v47_v42  ;;  %v1013_v12 = vld [vmem:[%s1299_s1 + $0x168] sm:$0xff]   ;;  %v1015_v16 = vld [vmem:[%s1299_s1 + $0x170] sm:$0xff]  }
  0x14   :  { %870 = vmatprep.subr.bf16.mxu0 %v985_v20  ;;  %558 = vmatprep.mubr.bf16.mxu0 %v117_v52  ;;  %v107_v9 = vcombine.high %v84_v5, %v98_v6  ;;  %v1014_v15 = vld [vmem:[%s1299_s1 + $0x128] sm:$0xff]   ;;  %v1016_v17 = vld [vmem:[%s1299_s1 + $0x130] sm:$0xff]   ;;  %v1018_v20 = vld [vmem:[%s1299_s1 + $0x138] sm:$0xff]  }
  0x15   :  { %891 = vmatpush3.bf16.msra.mxu1 %v984_v19  ;;  %598 = vmatprep.mubr.bf16.mxu1 %v119_v54  ;;  %v108_v11 = vcombine.low %v91_v7, %v105_v8  ;;  %v106_v19 = vcombine.low %v84_v5, %v98_v6  ;;  %v857_v54 = vld [vmem:[%s1302_s4] ss:$0 sm:$0xff] }
  0x16   :  { %892 = vmatprep.subr.bf16.mxu1 %v987_v22  ;;  %v121_v13 = vpack.c.bf16 %v107_v9, %v107_v9  ;;  %v687_v22 = vld [vmem:[%s1301_s3] sm:$0xff] }
  0x17   :  { %871 = vmatpush3.bf16.msra.mxu0 %v986_v21  ;;  %v122_v14 = vpack.c.bf16 %v108_v11, %v108_v11  ;;  %v120_v21 = vpack.c.bf16 %v106_v19, %v106_v19 }
  0x18   :  { %872 = vmatprep.subr.bf16.mxu0 %v989_v24 }
  0x19   :  { %893 = vmatpush3.bf16.msra.mxu1 %v988_v23  ;;  %v688_v23 = vld [vmem:[%s1301_s3 + $0x8] sm:$0xff] }
  0x1a   :  { %894 = vmatprep.subr.bf16.mxu1 %v991_v26  ;;  %v951_v24 = vpack.c.bf16 %v688_v23, %v687_v22  ;;  %v689_v26 = vld [vmem:[%s1301_s3 + $0x10] sm:$0xff] }
  0x1b   :  { %873 = vmatpush3.bf16.msra.mxu0 %v990_v25  ;;  %v1057_v25 = vmov 0.0|0.0  }
  0x1c   :  { %874 = vmatprep.subr.bf16.mxu0 %v993_v29 }
  0x1d   :  { %895 = vmatpush3.bf16.msra.mxu1 %v992_v27  ;;  %v690_v27 = vld [vmem:[%s1301_s3 + $0x18] sm:$0xf] }
  0x1e   :  { %896 = vmatprep.subr.bf16.mxu1 %v995_v31  ;;  %v954_v28 = vpack.c.bf16 %v690_v27, %v689_v26  ;;  %v806_v31 = vld [vmem:[%s1300_s2] ss:$0 sm:$0xff] }
  0x1f   :  { %875 = vmatpush3.bf16.msra.mxu0 %v994_v30 }
  0x20   :  { %904 = vmatprep.subr.bf16.mxu0 %v1001_v39 }
  0x21   :  { %897 = vmatpush3.bf16.msra.mxu1 %v1000_v38 }
  0x22   :  { %933 = vmatprep.subr.bf16.mxu1 %v1055_v43  ;;  %559 = vmatmul.mubr.bf16.vlgmr.msra.gmra.mrb[0].mxu0 %v116_v53 }
  0x23   :  { %905 = vmatpush3.bf16.msra.mxu0 %v1004_v55  ;;  %638 = vmatprep.mubr.bf16.mxu0 %v121_v13 }
  0x24   :  { %599 = vmatmul.mubr.bf16.vlgmr.msra.gmra.mrb[0].mxu1 %v118_v56  ;;  %906 = vmatprep.subr.bf16.mxu0 %v1005_v57 }
  0x25   :  { %935 = vmatprep.mubr.msk.bf16.mxu1 %vm1056_vm0, %v1055_v43  ;;  %934 = vmatpush3.bf16.msra.mxu1 %v1019_v62 }
  0x26   :  { %950 = vmatprep.subr.bf16.mxu1 %v1057_v25 }
  0x27   :  { %907 = vmatpush3.bf16.msra.mxu0 %v1006_v58 }
  0x28   :  { %908 = vmatprep.subr.bf16.mxu0 %v1007_v59 }
  0x2b   :  { %909 = vmatpush3.bf16.msra.mxu0 %v1008_v60 }
  0x2c   :  { %910 = vmatprep.subr.bf16.mxu0 %v1009_v61  ;;  %936 = vmatmul.mubr.msk.bf16.vlgmr.msra.gmra.mrb[4].mxu1 %vm522_vm1, %v122_v14 }
  0x2d   :  { %947 = vmatprep.mubr.msk.f32.mxu1 %vm1056_vm0, %v1055_v43  ;;  %952 = vmatpush3.bf16.msra.mxu1 %v951_v24 }
  0x2e   :  { %953 = vmatprep.subr.bf16.mxu1 %v1057_v25 }
  0x2f   :  { %911 = vmatpush3.bf16.msra.mxu0 %v1010_v63 }
  0x30   :  { %912 = vmatprep.subr.bf16.mxu0 %v1011_v4 }
  0x31   :  { %956 = vmatpush3.bf16.msk.msra.mxu1 %vm955_vm4, %v954_v28 }
  0x33   :  { %913 = vmatpush3.bf16.msra.mxu0 %v1012_v10 }
  0x34   :  { %914 = vmatprep.subr.bf16.mxu0 %v1013_v12 }
  0x37   :  { %915 = vmatpush3.bf16.msra.mxu0 %v1014_v15 }
  0x38   :  { %916 = vmatprep.subr.bf16.mxu0 %v1015_v16 }
  0x3b   :  { %917 = vmatpush3.bf16.msra.mxu0 %v1016_v17 }
  0x3c   :  { %918 = vmatprep.subr.bf16.mxu0 %v1017_v18 }
  0x3f   :  { %919 = vmatpush3.bf16.msra.mxu0 %v1018_v20 }
  0x42   :  { %639 = vmatmul.mubr.bf16.vlgmr.msra.gmra.mrb[4].mxu0 %v120_v21 }
  0xf5   :  { %v876_v29 = vpop.f32.mrb[0].mxu0 }
  0xf6   :  { %v877_v32 = vpop.f32.mrb[1].mxu0 }
  0xf7   :  { %v898_v30 = vpop.f32.mrb[0].mxu1  ;;  %v878_v34 = vadd.f32 %v877_v32, %v876_v29  ;;  %v879_v35 = vpop.f32.mrb[2].mxu0 }
  0xf8   :  { %v899_v33 = vpop.f32.mrb[1].mxu1  ;;  %v880_v38 = vpop.f32.mrb[3].mxu0 }
  0xf9   :  { %v900_v36 = vadd.f32 %v899_v33, %v898_v30  ;;  %v901_v37 = vpop.f32.mrb[2].mxu1  ;;  %v561_v40 = vadd.f32 %v878_v34, %v806_v31 }
  0xfa   :  { %v902_v39 = vpop.f32.mrb[3].mxu1 }
  0xfb   :  { %v601_v41 = vadd.f32 %v900_v36, %v561_v40 }
  0xff   :  { %v680_v42 = vpop.f32.mrb[4].mxu1 }
 0x100   :  { %v937_v43 = vpop.f32.mrb[5].mxu1 }
 0x101   :  { %v683_v44 = vpop.f32.mrb[6].mxu1 }
 0x102   :  { %v938_v45 = vpop.f32.mrb[7].mxu1 }
 0x115   :  { %v920_v46 = vpop.f32.mrb[4].mxu0 }
 0x116   :  { %v921_v47 = vpop.f32.mrb[5].mxu0 }
 0x117   :  { %v922_v48 = vadd.f32 %v921_v47, %v920_v46  ;;  %v923_v49 = vpop.f32.mrb[6].mxu0 }
 0x118   :  { %v924_v50 = vpop.f32.mrb[7].mxu0 }
 0x119   :  { %v641_v51 = vadd.f32 %v922_v48, %v601_v41 }
 0x11b   :  { %v681_v52 = vadd.f32 %v680_v42, %v641_v51 }
 0x11d   :  { %v686_v53 = vmax.f32 %v681_v52, 0.0 }
 0x11f   :  { %948 = vmatmul.mubr.msk.f32.vlgmr.msra.gmra.mrb[8].mxu1 %vm698_vm5, %v686_v53 }
 0x1f2   :  { %v772_v55 = vpop.f32.mrb[8].mxu1 }
 0x1f3   :  { %v773_v56 = vadd.f32 %v857_v54, %v772_v55  ;;  %v949_v57 = vpop.f32.mrb[9].mxu1 }
 0x1f5   :  { %v777_v58 = vsel %vm776_vm6, %v773_v56, -inf }
 0x1f6   :  { %778 = vmax.xlane.f32.xlu0 %v777_v58 }
 0x283   :  { %v779_v59 = vpop.xlane.xlu0 %778 }
 0x284   :  { %v780_v60 = vsub.f32 %v773_v56, %v779_v59 }
 0x286   :  { %v781_v61 = vmul.f32 1.442695, %v780_v60 }
 0x288   :  { %1026 = vpow2.f32 %v781_v61 }
 0x292   :  { %v1027_v62 = vpop.eup %1026 }
 0x293   :  { %v783_v63 = vsel %vm776_vm6, %v1027_v62, 0.0 }
 0x294   :  { %784 = vadd.xlane.f32.xlu0 %v783_v63 }
 0x321   :  { %v785_v0 = vpop.xlane.xlu0 %784 }
 0x322   :  { %1028 = vlog2.f32 %v785_v0 }
 0x32c   :  { %v1029_v1 = vpop.eup %1028 }
 0x32d   :  { %v787_v2 = vmul.f32 0.6931472, %v1029_v1 }
 0x32f   :  { %v788_v3 = vsub.f32 %v780_v60, %v787_v2 }
 0x331   :  { %789 = vst.msk [vmem:[#allocation2] sm:$0xff] %vm776_vm6, %v788_v3 }
 0x332   :  { %794 = vsyncadd [#allocation3], 96  ;;  %s1059_s4 = smov [#allocation2]  }
 0x333   :  { %s795_s15 = sshll.u32 %s1059_s4, 4  ;;  %s796_s15 = int_to_ptr.vmem [resolvable:$true] %s795_s15 }
 0x334   :  { %s1030_s16 = scalar_lea.vmem %s796_s15, 32  ;;  %s1034_s17 = scalar_lea.vmem %s796_s15, 128 }
 0x335   :  { %p1031_p0 = scmp.ne.s32.totalorder %s796_s15, %s1030_s16  ;;  %p1035_p1 = scmp.lt.s32.totalorder %s796_s15, %s796_s15 }
 0x336   :  { %p1036_p2 = scmp.lt.s32.totalorder %s1034_s17, %s1030_s16 }
 0x338   :  { %p1037_p3 = por %p1036_p2, %p1035_p1 }
 0x33a   :  { %p1038_p4 = pnand %p1037_p3, %p1031_p0 }
 0x33c   :  { %1041 = shalt.err (!%p1038_p4)
}
 0x33d   :  { %s1042_s20 = scalar_lea.hbm %s1303_s5, 32 }
 0x33e   :  { %p1043_p5 = scmp.ne.s32.totalorder %s1303_s5, %s1042_s20  ;;  %p1046_p6 = scmp.lt.u32.totalorder %s1042_s20, %s1303_s5 }
 0x340   :  { %p1048_p7 = pnand %p1046_p6, %p1043_p5 }
 0x342   :  { %1051 = shalt.err (!%p1048_p7)
}
 0x343   :  { %s1060_s24 = smov 32   ;;  %s1061_s25 = smov 2  }
 0x344   :  { %801 = dma.vmem_to_hbm [thread:$0]  %s796_s15, 32, %s1303_s5, [#allocation3], %s1060_s24, %s1060_s24, %s1061_s25  }
 0x345   :  { %1052 = dma.done.wait [#allocation3], 128  }
 0x346   :  { %1053 = vsyncadd [#allocation3], 4294967168 }
 0x347   :  { %805 = vsyncpa [#allocation3], 1 }

</bundles_post_ra>
